<compile_context>
chip_gen: v6e
topology: v6e:2x2x1
jax: 0.10.0
libtpu: 0.0.40
codegen_flags: <defaults>
</compile_context>

<pallas_src>
import functools

import jax
import jax.numpy as jnp
from jax import lax
from jax.experimental import pallas as pl
from jax.experimental.pallas import tpu as pltpu

BN_EPS = 1e-5
_TILE_M_MAX = 8192  # lane-axis tile (multiple of 128); keeps VMEM use tiny on all chips


def _round_up(x, m):
    return (x + m - 1) // m * m


# --------------------------------------------------------------------------
# Kernels
# --------------------------------------------------------------------------
def _stats_kernel(x_ref, *refs, n_prev, tile_m, m_total):
    """Accumulate per-channel sum / sum-of-squares of y_l = W_l · a_{l-1}.

    refs = (W'_0, shift_0, ..., W'_{n_prev-1}, shift_{n_prev-1},
            W_l_raw, sum_ref, sumsq_ref)
    sum_ref / sumsq_ref: (Cout_l, 1) accumulators, VMEM-resident across the
    'arbitrary' M grid axis (constant output block index).
    """
    sum_ref, sq_ref = refs[-2], refs[-1]
    w_raw = refs[-3]
    i = pl.program_id(0)

    @pl.when(i == 0)
    def _():
        sum_ref[...] = jnp.zeros_like(sum_ref)
        sq_ref[...] = jnp.zeros_like(sq_ref)

    # Recompute the already-folded layers (cheap: K <= 32) — avoids ever
    # writing intermediate activations to HBM.
    a = x_ref[...]
    for k in range(n_prev):
        w = refs[2 * k][...]
        s = refs[2 * k + 1][...]
        a = jnp.maximum(
            jnp.dot(w, a, preferred_element_type=jnp.float32) + s, 0.0)

    y = jnp.dot(w_raw[...], a, preferred_element_type=jnp.float32)

    if m_total % tile_m != 0:
        # Mask the zero-padded tail columns of the last tile so they don't
        # pollute the batch statistics.
        col = lax.broadcasted_iota(jnp.int32, (1, tile_m), 1)
        valid = (i * tile_m + col) < m_total
        y = jnp.where(valid, y, 0.0)

    sum_ref[...] += jnp.sum(y, axis=1, keepdims=True)
    sq_ref[...] += jnp.sum(y * y, axis=1, keepdims=True)


def _chain_kernel(x_ref, *refs, n_layers):
    """Apply the full folded (conv*scale + shift + ReLU) chain; lane-dense output."""
    o_ref = refs[-1]
    a = x_ref[...]
    for k in range(n_layers):
        w = refs[2 * k][...]
        s = refs[2 * k + 1][...]
        a = jnp.maximum(
            jnp.dot(w, a, preferred_element_type=jnp.float32) + s, 0.0)
    o_ref[...] = a.astype(o_ref.dtype)


# --------------------------------------------------------------------------
# pallas_call wrappers
# --------------------------------------------------------------------------
def _layer_stats(x_cm, folded, w_raw, tile_m, m_total):
    """Per-channel (sum, sum_sq) of y = W_raw · chain(x) over all M pixels."""
    cin, m_pad = x_cm.shape
    cout = w_raw.shape[0]
    grid = (m_pad // tile_m,)

    in_specs = [pl.BlockSpec((cin, tile_m), lambda i: (0, i))]
    args = [x_cm]
    for wf, sh in folded:
        in_specs.append(pl.BlockSpec(wf.shape, lambda i: (0, 0)))
        in_specs.append(pl.BlockSpec(sh.shape, lambda i: (0, 0)))
        args += [wf, sh]
    in_specs.append(pl.BlockSpec(w_raw.shape, lambda i: (0, 0)))
    args.append(w_raw)

    kernel = functools.partial(
        _stats_kernel, n_prev=len(folded), tile_m=tile_m, m_total=m_total)
    sums, sumsq = pl.pallas_call(
        kernel,
        out_shape=(jax.ShapeDtypeStruct((cout, 1), jnp.float32),
                   jax.ShapeDtypeStruct((cout, 1), jnp.float32)),
        grid=grid,
        in_specs=in_specs,
        out_specs=(pl.BlockSpec((cout, 1), lambda i: (0, 0)),
                   pl.BlockSpec((cout, 1), lambda i: (0, 0))),
        compiler_params=pltpu.CompilerParams(
            dimension_semantics=("arbitrary",)),
    )(*args)
    return sums, sumsq


def _chain_apply(x_cm, folded, tile_m):
    """Final pass: write relu(W'·...·relu(W'_0·x + s_0)... + s_last) to HBM."""
    cin, m_pad = x_cm.shape
    cout = folded[-1][0].shape[0]
    grid = (m_pad // tile_m,)

    in_specs = [pl.BlockSpec((cin, tile_m), lambda i: (0, i))]
    args = [x_cm]
    for wf, sh in folded:
        in_specs.append(pl.BlockSpec(wf.shape, lambda i: (0, 0)))
        in_specs.append(pl.BlockSpec(sh.shape, lambda i: (0, 0)))
        args += [wf, sh]

    kernel = functools.partial(_chain_kernel, n_layers=len(folded))
    return pl.pallas_call(
        kernel,
        out_shape=jax.ShapeDtypeStruct((cout, m_pad), jnp.float32),
        grid=grid,
        in_specs=in_specs,
        out_specs=pl.BlockSpec((cout, tile_m), lambda i: (0, i)),
        compiler_params=pltpu.CompilerParams(
            dimension_semantics=("parallel",)),
    )(*args)


# --------------------------------------------------------------------------
# Parameters / forward
# --------------------------------------------------------------------------
def init_mlp_params(key, in_channels, out_channels):
    """Mimics nn.Conv2d(k=1) + nn.BatchNorm2d default init (w:(Cout,Cin))."""
    channels = [in_channels] + list(out_channels)
    params = []
    for i in range(1, len(channels)):
        cin, cout = channels[i - 1], channels[i]
        key, kw, kb = jax.random.split(key, 3)
        bound = 1.0 / jnp.sqrt(jnp.float32(cin))
        w = jax.random.uniform(kw, (cout, cin), jnp.float32, -bound, bound)
        b = jax.random.uniform(kb, (cout,), jnp.float32, -bound, bound)
        gamma = jnp.ones((cout,), jnp.float32)
        beta = jnp.zeros((cout,), jnp.float32)
        params.append((w, b, gamma, beta))
    return params


def mlp_forward(x_nchw, params):
    """x_nchw: (N, C, H, W) float32 -> (N, C_out, H, W) float32."""
    N, C, H, W = x_nchw.shape
    M = N * H * W
    tile_m = min(_TILE_M_MAX, _round_up(M, 128))
    m_pad = _round_up(M, tile_m)

    # NCHW -> (C, N*H*W): channels on sublanes, pixels lane-dense.
    x_cm = jnp.transpose(x_nchw, (1, 0, 2, 3)).reshape(C, M)
    if m_pad != M:
        x_cm = jnp.pad(x_cm, ((0, 0), (0, m_pad - M)))

    folded = []  # list of (W_folded (Cout,Cin), shift (Cout,1))
    for (w, b, gamma, beta) in params:
        del b  # conv bias is exactly cancelled by train-mode BN mean subtraction
        sums, sumsq = _layer_stats(x_cm, folded, w, tile_m, M)
        mean = sums[:, 0] / M
        # NOTE: E[y^2]-mean^2 in f32; fine for moderate |mean|/std (see review).
        var = jnp.maximum(sumsq[:, 0] / M - mean * mean, 0.0)
        scale = gamma / jnp.sqrt(var + BN_EPS)
        shift = beta - mean * scale
        folded.append((w * scale[:, None], shift[:, None]))

    y_cm = _chain_apply(x_cm, folded, tile_m)[:, :M]
    cout = folded[-1][0].shape[0]
    return y_cm.reshape(cout, N, H, W).transpose(1, 0, 2, 3)


def mlp_reference(x_nchw, params):
    """Pure-JAX reference matching PyTorch train-mode forward."""
    x = x_nchw
    for (w, b, gamma, beta) in params:
        y = jnp.einsum('nchw,oc->nohw', x, w) + b[None, :, None, None]
        mean = jnp.mean(y, axis=(0, 2, 3), keepdims=True)
        var = jnp.mean((y - mean) ** 2, axis=(0, 2, 3), keepdims=True)
        y = (y - mean) / jnp.sqrt(var + BN_EPS)
        y = y * gamma[None, :, None, None] + beta[None, :, None, None]
        x = jnp.maximum(y, 0.0)
    return x


if __name__ == "__main__":
    key = jax.random.PRNGKey(0)
    kx, kp = jax.random.split(key)

    N, Cin, H, W = 2, 4, 16, 16
    out_channels = [32, 16]

    x = jax.random.normal(kx, (N, Cin, H, W), jnp.float32)
    params = init_mlp_params(kp, Cin, out_channels)

    y = mlp_forward(x, params)
    jax.block_until_ready(y)
    assert y.shape == (N, out_channels[-1], H, W), y.shape

    y_ref = mlp_reference(x, params)
    err = float(jnp.max(jnp.abs(y - y_ref)))
    assert err < 2e-3, err

    print("KERNEL_OK")
</pallas_src>

<mosaic_0001>
module attributes {stable_mosaic.version = 11 : i64} {
  func.func @_stats_kernel(%arg0: i32, %arg1: memref<4x512xf32, #tpu.memory_space<vmem>>, %arg2: memref<32x4xf32, #tpu.memory_space<vmem>>, %arg3: memref<32x1xf32, #tpu.memory_space<vmem>>, %arg4: memref<32x1xf32, #tpu.memory_space<vmem>>) attributes {dimension_semantics = [#tpu.dimension_semantics<arbitrary>], iteration_bounds = array<i64: 1>, scalar_prefetch = 0 : i64, scratch_operands = 0 : i64, tpu.core_type = #tpu.core_type<tc>, window_params = [{transform_indices = @transform_0, window_bounds = array<i64: 4, 512>}, {pipeline_mode = #tpu.pipeline_mode<synchronous>, transform_indices = @transform_1, window_bounds = array<i64: 32, 4>}, {pipeline_mode = #tpu.pipeline_mode<synchronous>, transform_indices = @transform_2, window_bounds = array<i64: 32, 1>}, {pipeline_mode = #tpu.pipeline_mode<synchronous>, transform_indices = @transform_3, window_bounds = array<i64: 32, 1>}]} {
    %c0_i32 = arith.constant 0 : i32
    %0 = arith.cmpi eq, %arg0, %c0_i32 : i32
    %1 = arith.extui %0 : i1 to i32
    %c0_i32_0 = arith.constant 0 : i32
    %2 = arith.cmpi ne, %1, %c0_i32_0 : i32
    scf.if %2 {
      %cst_14 = arith.constant 0.000000e+00 : f32
      %17 = vector.broadcast %cst_14 : f32 to vector<32x1xf32>
      %c0_15 = arith.constant 0 : index
      %c0_16 = arith.constant 0 : index
      %18 = vector.load %arg3[%c0_15, %c0_16] : memref<32x1xf32, #tpu.memory_space<vmem>>, vector<32x1xf32>
      tpu.vector_store %arg3[%c0_15, %c0_16], %17 {strides = array<i32>} : memref<32x1xf32, #tpu.memory_space<vmem>>, vector<32x1xf32>,
      %cst_17 = arith.constant 0.000000e+00 : f32
      %19 = vector.broadcast %cst_17 : f32 to vector<32x1xf32>
      %c0_18 = arith.constant 0 : index
      %c0_19 = arith.constant 0 : index
      %20 = vector.load %arg4[%c0_18, %c0_19] : memref<32x1xf32, #tpu.memory_space<vmem>>, vector<32x1xf32>
      tpu.vector_store %arg4[%c0_18, %c0_19], %19 {strides = array<i32>} : memref<32x1xf32, #tpu.memory_space<vmem>>, vector<32x1xf32>,
    } else {
    }
    %c0 = arith.constant 0 : index
    %c0_1 = arith.constant 0 : index
    %3 = vector.load %arg1[%c0, %c0_1] : memref<4x512xf32, #tpu.memory_space<vmem>>, vector<4x512xf32>
    %c0_2 = arith.constant 0 : index
    %c0_3 = arith.constant 0 : index
    %4 = vector.load %arg2[%c0_2, %c0_3] : memref<32x4xf32, #tpu.memory_space<vmem>>, vector<32x4xf32>
    %cst = arith.constant dense<0.000000e+00> : vector<32x512xf32>
    %5 = tpu.matmul %4, %3, %cst {dimension_numbers = #tpu.dot_dimension_numbers<[1], [0], [0], [1], [0, 0, 1, 1], [], []>} : vector<32x4xf32>, vector<4x512xf32>, vector<32x512xf32> -> vector<32x512xf32>
    %c0_4 = arith.constant 0 : index
    %c0_5 = arith.constant 0 : index
    %6 = vector.load %arg3[%c0_4, %c0_5] : memref<32x1xf32, #tpu.memory_space<vmem>>, vector<32x1xf32>
    %cst_6 = arith.constant dense<0.000000e+00> : vector<32xf32>
    %7 = vector.multi_reduction <add>, %5, %cst_6 [1] : vector<32x512xf32> to vector<32xf32>
    %8 = vector.shape_cast %7 : vector<32xf32> to vector<32x1xf32>
    %9 = arith.addf %6, %8 : vector<32x1xf32>
    %c0_7 = arith.constant 0 : index
    %c0_8 = arith.constant 0 : index
    %10 = vector.load %arg3[%c0_7, %c0_8] : memref<32x1xf32, #tpu.memory_space<vmem>>, vector<32x1xf32>
    tpu.vector_store %arg3[%c0_7, %c0_8], %9 {strides = array<i32>} : memref<32x1xf32, #tpu.memory_space<vmem>>, vector<32x1xf32>,
    %c0_9 = arith.constant 0 : index
    %c0_10 = arith.constant 0 : index
    %11 = vector.load %arg4[%c0_9, %c0_10] : memref<32x1xf32, #tpu.memory_space<vmem>>, vector<32x1xf32>
    %12 = arith.mulf %5, %5 : vector<32x512xf32>
    %cst_11 = arith.constant dense<0.000000e+00> : vector<32xf32>
    %13 = vector.multi_reduction <add>, %12, %cst_11 [1] : vector<32x512xf32> to vector<32xf32>
    %14 = vector.shape_cast %13 : vector<32xf32> to vector<32x1xf32>
    %15 = arith.addf %11, %14 : vector<32x1xf32>
    %c0_12 = arith.constant 0 : index
    %c0_13 = arith.constant 0 : index
    %16 = vector.load %arg4[%c0_12, %c0_13] : memref<32x1xf32, #tpu.memory_space<vmem>>, vector<32x1xf32>
    tpu.vector_store %arg4[%c0_12, %c0_13], %15 {strides = array<i32>} : memref<32x1xf32, #tpu.memory_space<vmem>>, vector<32x1xf32>,
    return
  }
  func.func @transform_0(%arg0: i32) -> (i32, i32) {
    %c0_i32 = arith.constant 0 : i32
    %c0_i32_0 = arith.constant 0 : i32
    return %c0_i32, %arg0 : i32, i32
  }
  func.func @transform_1(%arg0: i32) -> (i32, i32) {
    %c0_i32 = arith.constant 0 : i32
    %c0_i32_0 = arith.constant 0 : i32
    %c0_i32_1 = arith.constant 0 : i32
    return %c0_i32, %c0_i32_0 : i32, i32
  }
  func.func @transform_2(%arg0: i32) -> (i32, i32) {
    %c0_i32 = arith.constant 0 : i32
    %c0_i32_0 = arith.constant 0 : i32
    %c0_i32_1 = arith.constant 0 : i32
    return %c0_i32, %c0_i32_0 : i32, i32
  }
  func.func @transform_3(%arg0: i32) -> (i32, i32) {
    %c0_i32 = arith.constant 0 : i32
    %c0_i32_0 = arith.constant 0 : i32
    %c0_i32_1 = arith.constant 0 : i32
    return %c0_i32, %c0_i32_0 : i32, i32
  }
}

</mosaic_0001>

<bundles_post_ra>
// kernel: tpu_custom_call.1
= control target key start
LH: loop header
LB: loop body
LE: loop exit
PB: predicated region body
PF: predicated region fallthrough
CT: control target
= control target key end

     0   :  { %vm49_vm0 = vcmask 1043456   ;;  %v340_v1 = vmov 0.0   ;;  %vm36_vm1 = vcmask 31744   ;;  %vm17_vm2 = vcmask 7168   ;;  %s491_s0 = inlined_call_operand.vmem [shape: f32[4,512], index: 0, kind: input, shape index: {}]   ;;  %s492_s1 = inlined_call_operand.vmem [shape: f32[32,4], index: 1, kind: input, shape index: {}]   ;;  %s493_s2 = inlined_call_operand.vmem [shape: f32[32,1], index: 2, kind: output, shape index: {0}]   ;;  %s494_s3 = inlined_call_operand.vmem [shape: f32[32,1], index: 3, kind: output, shape index: {1}]  }
   0x1   :  { %v26_v0 = vld [vmem:[%s491_s0] sm:$0xff]  ;;  %122 = vmatprep.mubr.f32.mxu0 %v340_v1  ;;  %v27_v2 = vld [vmem:[%s491_s0 + $0x8] sm:$0xff]  ;;  %211 = vmatprep.mubr.f32.mxu1 %v340_v1  ;;  %v30_v7 = vld [vmem:[%s492_s1 + $0x10] sm:$0xff]  ;;  %18 = vst.msk [vmem:[%s493_s2] sm:$0xff] %vm17_vm2, %v340_v1 }
   0x2   :  { %v34_v3 = vcombine.high %v26_v0, %v26_v0  ;;  %v35_v4 = vcombine.high %v27_v2, %v27_v2  ;;  %v28_v5 = vld [vmem:[%s492_s1] sm:$0xff]  ;;  %v29_v6 = vld [vmem:[%s492_s1 + $0x8] sm:$0xff]  ;;  %v31_v8 = vld [vmem:[%s492_s1 + $0x18] sm:$0xff]  ;;  %19 = vst.msk [vmem:[%s493_s2 + $0x8] sm:$0xff] %vm17_vm2, %v340_v1 }
   0x3   :  { %20 = vst.msk [vmem:[%s493_s2 + $0x10] sm:$0xff] %vm17_vm2, %v340_v1  ;;  %21 = vst.msk [vmem:[%s493_s2 + $0x18] sm:$0xff] %vm17_vm2, %v340_v1 }
   0x4   :  { %325 = vmatprep.subr.msk.mxu0 %vm49_vm0, %v34_v3  ;;  %331 = vmatprep.subr.msk.mxu1 %vm49_vm0, %v35_v4  ;;  %22 = vst.msk [vmem:[%s494_s3] sm:$0xff] %vm17_vm2, %v340_v1  ;;  %23 = vst.msk [vmem:[%s494_s3 + $0x8] sm:$0xff] %vm17_vm2, %v340_v1 }
   0x5   :  { %326 = vmatpush1.msk.msra.mxu0 %vm49_vm0, %v26_v0  ;;  %332 = vmatpush1.msk.msra.mxu1 %vm49_vm0, %v27_v2  ;;  %24 = vst.msk [vmem:[%s494_s3 + $0x10] sm:$0xff] %vm17_vm2, %v340_v1  ;;  %25 = vst.msk [vmem:[%s494_s3 + $0x18] sm:$0xff] %vm17_vm2, %v340_v1 }
   0x6   :  { %327 = vmatmul.mubr.msk.f32.vlgmr.msra.gmra.mxu0 %vm36_vm1, %v28_v5  ;;  %333 = vmatmul.mubr.msk.f32.vlgmr.msra.gmra.mxu1 %vm36_vm1, %v28_v5 }
   0x7   :  { %128 = vmatprep.mubr.f32.mxu0 %v340_v1  ;;  %217 = vmatprep.mubr.f32.mxu1 %v340_v1 }
   0x8   :  { %v236_v2 = vld [vmem:[%s493_s2] sm:$0xff] }
   0xa   :  { %328 = vmatmul.mubr.msk.f32.gmra.mxu0 %vm36_vm1, %v29_v6  ;;  %334 = vmatmul.mubr.msk.f32.gmra.mxu1 %vm36_vm1, %v29_v6 }
   0xb   :  { %134 = vmatprep.mubr.f32.mxu0 %v340_v1  ;;  %223 = vmatprep.mubr.f32.mxu1 %v340_v1  ;;  %v269_v4 = vld [vmem:[%s494_s3] sm:$0xff]  ;;  %v270_v6 = vld [vmem:[%s494_s3 + $0x8] sm:$0xff] }
   0xe   :  { %329 = vmatmul.mubr.msk.f32.gmra.mxu0 %vm36_vm1, %v30_v7  ;;  %335 = vmatmul.mubr.msk.f32.gmra.mxu1 %vm36_vm1, %v30_v7 }
   0xf   :  { %140 = vmatprep.mubr.f32.mxu0 %v340_v1  ;;  %229 = vmatprep.mubr.f32.mxu1 %v340_v1 }
  0x12   :  { %330 = vmatmul.mubr.msk.f32.gmra.mxu0 %vm36_vm1, %v31_v8  ;;  %336 = vmatmul.mubr.msk.f32.gmra.mxu1 %vm36_vm1, %v31_v8 }
  0xc6   :  { %v124_v9 = vpop.f32.mrf.mxu0  ;;  %v213_v10 = vpop.f32.mrf.mxu1 }
  0xc7   :  { %v273_v13 = vmul.f32 %v124_v9, %v124_v9  ;;  %v275_v16 = vmul.f32 %v213_v10, %v213_v10 }
  0xc8   :  { %v126_v11 = vpop.f32.mrf.mxu0  ;;  %v215_v12 = vpop.f32.mrf.mxu1 }
  0xc9   :  { %v240_v14 = vadd.f32 %v126_v11, %v124_v9  ;;  %v274_v15 = vmul.f32 %v126_v11, %v126_v11  ;;  %v276_v31 = vmul.f32 %v215_v12, %v215_v12  ;;  %v237_v9 = vld [vmem:[%s493_s2 + $0x8] sm:$0xff] }
  0xca   :  { %v130_v17 = vpop.f32.mrf.mxu0  ;;  %v219_v18 = vpop.f32.mrf.mxu1 }
  0xcb   :  { %v289_v19 = vadd.f32 %v274_v15, %v273_v13  ;;  %v241_v20 = vadd.f32 %v240_v14, %v213_v10  ;;  %v277_v21 = vmul.f32 %v130_v17, %v130_v17  ;;  %v279_v26 = vmul.f32 %v219_v18, %v219_v18  ;;  %v271_v15 = vld [vmem:[%s494_s3 + $0x10] sm:$0xff] }
  0xcc   :  { %v132_v22 = vpop.f32.mrf.mxu0  ;;  %v221_v23 = vpop.f32.mrf.mxu1 }
  0xcd   :  { %v245_v24 = vadd.f32 %v132_v22, %v130_v17  ;;  %v278_v25 = vmul.f32 %v132_v22, %v132_v22  ;;  %v242_v27 = vadd.f32 %v241_v20, %v215_v12  ;;  %v290_v30 = vadd.f32 %v289_v19, %v275_v16  ;;  %v238_v12 = vld [vmem:[%s493_s2 + $0x10] sm:$0xff]  ;;  %v272_v22 = vld [vmem:[%s494_s3 + $0x18] sm:$0xff] }
  0xce   :  { %v136_v28 = vpop.f32.mrf.mxu0  ;;  %v225_v29 = vpop.f32.mrf.mxu1  ;;  %v280_v35 = vmul.f32 %v221_v23, %v221_v23 }
  0xcf   :  { %v294_v32 = vadd.f32 %v278_v25, %v277_v21  ;;  %v281_v33 = vmul.f32 %v136_v28, %v136_v28  ;;  %243 = vadd.xlane.f32.xlu0 %v242_v27  ;;  %v246_v34 = vadd.f32 %v245_v24, %v219_v18  ;;  %v291_v40 = vadd.f32 %v290_v30, %v276_v31  ;;  %v239_v18 = vld [vmem:[%s493_s2 + $0x18] sm:$0xff] }
  0xd0   :  { %v138_v36 = vpop.f32.mrf.mxu0  ;;  %v227_v37 = vpop.f32.mrf.mxu1  ;;  %v283_v43 = vmul.f32 %v225_v29, %v225_v29 }
  0xd1   :  { %v250_v38 = vadd.f32 %v138_v36, %v136_v28  ;;  %v282_v39 = vmul.f32 %v138_v36, %v138_v36  ;;  %v295_v41 = vadd.f32 %v294_v32, %v279_v26  ;;  %v284_v52 = vmul.f32 %v227_v37, %v227_v37 }
  0xd2   :  { %v142_v42 = vpop.f32.mrf.mxu0  ;;  %v231_v49 = vpop.f32.mrf.mxu1  ;;  %v247_v53 = vadd.f32 %v246_v34, %v221_v23 }
  0xd3   :  { %v299_v44 = vadd.f32 %v282_v39, %v281_v33  ;;  %v285_v45 = vmul.f32 %v142_v42, %v142_v42  ;;  %v251_v46 = vadd.f32 %v250_v38, %v225_v29  ;;  %292 = vadd.xlane.f32.xlu0 %v291_v40  ;;  %v296_v47 = vadd.f32 %v295_v41, %v280_v35 }
  0xd4   :  { %v144_v48 = vpop.f32.mrf.mxu0  ;;  %v287_v57 = vmul.f32 %v231_v49, %v231_v49  ;;  %v233_v59 = vpop.f32.mrf.mxu1 }
  0xd5   :  { %v255_v50 = vadd.f32 %v144_v48, %v142_v42  ;;  %v286_v51 = vmul.f32 %v144_v48, %v144_v48  ;;  %297 = vadd.xlane.f32.xlu1 %v296_v47  ;;  %v300_v54 = vadd.f32 %v299_v44, %v283_v43  ;;  %v252_v58 = vadd.f32 %v251_v46, %v227_v37 }
  0xd6   :  { %v288_v62 = vmul.f32 %v233_v59, %v233_v59 }
  0xd7   :  { %v304_v55 = vadd.f32 %v286_v51, %v285_v45  ;;  %v256_v56 = vadd.f32 %v255_v50, %v231_v49  ;;  %248 = vadd.xlane.f32.xlu0 %v247_v53  ;;  %v301_v60 = vadd.f32 %v300_v54, %v284_v52 }
  0xd9   :  { %253 = vadd.xlane.f32.xlu1 %v252_v58  ;;  %v257_v61 = vadd.f32 %v256_v56, %v233_v59  ;;  %v305_v63 = vadd.f32 %v304_v55, %v287_v57 }
  0xdb   :  { %302 = vadd.xlane.f32.xlu0 %v301_v60  ;;  %v306_v0 = vadd.f32 %v305_v63, %v288_v62 }
  0xdd   :  { %258 = vadd.xlane.f32.xlu1 %v257_v61 }
  0xe1   :  { %307 = vadd.xlane.f32.xlu1 %v306_v0 }
 0x158   :  { %v244_v1 = vpop.xlane.xlu0 %243 }
 0x159   :  { %v260_v3 = vadd.f32 %v244_v1, %v236_v2 }
 0x15b   :  { %265 = vst.msk [vmem:[%s493_s2] sm:$0xff] %vm17_vm2, %v260_v3 }
 0x15c   :  { %v293_v5 = vpop.xlane.xlu0 %292 }
 0x15d   :  { %v309_v7 = vadd.f32 %v293_v5, %v269_v4 }
 0x15e   :  { %v298_v8 = vpop.xlane.xlu1 %297 }
 0x15f   :  { %313 = vst.msk [vmem:[%s494_s3] sm:$0xff] %vm17_vm2, %v309_v7  ;;  %v310_v10 = vadd.f32 %v298_v8, %v270_v6 }
 0x160   :  { %v249_v11 = vpop.xlane.xlu0 %248 }
 0x161   :  { %314 = vst.msk [vmem:[%s494_s3 + $0x8] sm:$0xff] %vm17_vm2, %v310_v10  ;;  %v261_v13 = vadd.f32 %v249_v11, %v237_v9 }
 0x162   :  { %v254_v14 = vpop.xlane.xlu1 %253 }
 0x163   :  { %266 = vst.msk [vmem:[%s493_s2 + $0x8] sm:$0xff] %vm17_vm2, %v261_v13  ;;  %v262_v16 = vadd.f32 %v254_v14, %v238_v12 }
 0x164   :  { %v303_v17 = vpop.xlane.xlu0 %302 }
 0x165   :  { %267 = vst.msk [vmem:[%s493_s2 + $0x10] sm:$0xff] %vm17_vm2, %v262_v16  ;;  %v311_v19 = vadd.f32 %v303_v17, %v271_v15 }
 0x166   :  { %v259_v20 = vpop.xlane.xlu1 %258 }
 0x167   :  { %315 = vst.msk [vmem:[%s494_s3 + $0x10] sm:$0xff] %vm17_vm2, %v311_v19  ;;  %v263_v21 = vadd.f32 %v259_v20, %v239_v18 }
 0x169   :  { %268 = vst.msk [vmem:[%s493_s2 + $0x18] sm:$0xff] %vm17_vm2, %v263_v21 }
 0x16a   :  { %v308_v23 = vpop.xlane.xlu1 %307 }
 0x16b   :  { %v312_v24 = vadd.f32 %v308_v23, %v272_v22 }
 0x16d   :  { %316 = vst.msk [vmem:[%s494_s3 + $0x18] sm:$0xff] %vm17_vm2, %v312_v24 }

</bundles_post_ra>
